<compile_context>
chip_gen: v7x
topology: tpu7x:2x2x1
jax: 0.10.0
libtpu: 0.0.40
codegen_flags: <defaults>
</compile_context>

<pallas_src>
import functools

import jax
import jax.numpy as jnp
from jax import lax
from jax.experimental import pallas as pl
from jax.experimental.pallas import tpu as pltpu


EPSILON = 1e-5

_LANE = 128
_SUBLANE_F32 = 8
# ~4 MiB activation blocks: at v7x's 3.2 TB/s this amortizes the ~0.35 us
# per-grid-step overhead; v5e/v6e are already near roofline at this size.
_TARGET_BLOCK_BYTES = 4 << 20
_MAX_COL_TILE = 4096          # multiple of 128
_VMEM_HEADROOM = 8 << 20
_VMEM_FLOOR = 16 << 20
_VMEM_CEIL = 32 << 20         # stay well inside v7x's 64 MiB physical VMEM


def _sublane_pack(itemsize):
    """Sublane packing per dtype width: 8 (f32), 16 (bf16/f16), 32 (int8/fp8)."""
    return _SUBLANE_F32 * max(1, 4 // int(itemsize))


def _pad_up(v, m):
    return -(-int(v) // int(m)) * int(m)


def _pick_col_tile(cols, max_col_tile=_MAX_COL_TILE):
    """Lane-dense column tile: full extent if small enough, otherwise a
    128-multiple tile, preferring one that divides `cols` exactly so there is
    no nearly-empty masked edge block."""
    if cols <= max_col_tile:
        return cols                       # full extent is always a legal block dim
    floor = max(_LANE, max_col_tile // 4)
    for ct in range(max_col_tile, floor - 1, -_LANE):
        if cols % ct == 0:
            return ct
    return max_col_tile                   # edge block handled by the cdiv grid


def _pick_row_tile(rows, col_tile, itemsize, pack,
                   target_bytes=_TARGET_BLOCK_BYTES):
    """Row tile sized against the *padded* (lane/sublane) block footprint."""
    padded_cols = _pad_up(col_tile, _LANE)
    budget_rows = max(pack, target_bytes // max(1, padded_cols * itemsize))
    if budget_rows >= rows:
        return rows                       # full extent is always legal
    return max(pack, (budget_rows // pack) * pack)


def _frozen_bn_affine_kernel(x_ref, scale_ref, shift_ref, o_ref):
    """y = x * scale + shift.

    x_ref/o_ref: (TR, TC) activation tile.
    scale_ref/shift_ref: (TR, 1) or (1, TC) f32 tile, broadcast by the VPU.
    """
    x = x_ref[...].astype(jnp.float32)
    o_ref[...] = (x * scale_ref[...] + shift_ref[...]).astype(o_ref.dtype)


@functools.partial(jax.jit, static_argnames=("epsilon",))
def frozen_batch_norm_2d(x_nchw, weight, bias, running_mean, running_var,
                         *, epsilon=EPSILON):
    """x_nchw: (N, C, H, W). Params: (C,). Returns (N, C, H, W)."""
    N, C, H, W = x_nchw.shape
    hw = H * W
    itemsize = int(x_nchw.dtype.itemsize)
    pack = _sublane_pack(itemsize)

    # Per-channel affine derived once in f32, outside the bandwidth-bound kernel.
    scale = (weight.astype(jnp.float32)
             * lax.rsqrt(running_var.astype(jnp.float32) + epsilon))
    shift = bias.astype(jnp.float32) - running_mean.astype(jnp.float32) * scale

    lane_dense_hw = (hw % _LANE == 0)

    if lane_dense_hw:
        # (N*C, H*W) view: spatial axis is already a 128-multiple on the lanes.
        rows, cols = N * C, hw
        x_flat = x_nchw.reshape(rows, cols)           # free: contiguous NCHW
        scale_arr = jnp.tile(scale, N).reshape(rows, 1)   # row n*C + c -> scale[c]
        shift_arr = jnp.tile(shift, N).reshape(rows, 1)
    else:
        # Small / non-128-multiple H*W: fold channels into the lane axis.
        # Extra scale/shift storage is only C*H*W*4 bytes each.
        rows, cols = N, C * hw
        x_flat = x_nchw.reshape(rows, cols)            # free: contiguous NCHW
        scale_arr = jnp.repeat(scale, hw).reshape(1, cols)  # element c*hw+s -> scale[c]
        shift_arr = jnp.repeat(shift, hw).reshape(1, cols)

    col_tile = _pick_col_tile(cols)
    row_tile = _pick_row_tile(rows, col_tile, itemsize, pack)
    n_row_blocks = pl.cdiv(rows, row_tile)
    n_col_blocks = pl.cdiv(cols, col_tile)

    if lane_dense_hw:
        # Affine blocks are (row_tile, 1) and indexed by the row block; keep the
        # row axis outermost so they stay resident across the inner column sweep.
        grid = (n_row_blocks, n_col_blocks)
        x_index = lambda i, j: (i, j)
        aff_index = lambda i, j: (i, 0)
        aff_block = (row_tile, 1)
    else:
        # Affine blocks are (1, col_tile) and indexed by the column block; keep
        # the column axis outermost so they stay resident across the row sweep.
        grid = (n_col_blocks, n_row_blocks)
        x_index = lambda j, i: (i, j)
        aff_index = lambda j, i: (0, j)
        aff_block = (1, col_tile)

    # VMEM accounting against *padded* block shapes (lane pad to 128, sublane
    # pad to the dtype packing), double-buffered in/out plus the padded
    # scale/shift blocks (always f32, sublane-padded to 8).
    padded_cols = _pad_up(col_tile, _LANE)
    padded_rows = _pad_up(row_tile, pack)
    x_blk_bytes = padded_rows * padded_cols * itemsize
    aff_blk_bytes = _pad_up(aff_block[0], _SUBLANE_F32) * _pad_up(aff_block[1], _LANE) * 4
    footprint = 2 * (2 * x_blk_bytes) + 2 * (2 * aff_blk_bytes)
    vmem_limit = int(min(_VMEM_CEIL, max(_VMEM_FLOOR, footprint + _VMEM_HEADROOM)))

    out_flat = pl.pallas_call(
        _frozen_bn_affine_kernel,
        out_shape=jax.ShapeDtypeStruct((rows, cols), x_nchw.dtype),
        grid_spec=pltpu.PrefetchScalarGridSpec(
            num_scalar_prefetch=0,
            grid=grid,
            in_specs=[
                pl.BlockSpec((row_tile, col_tile), x_index),
                pl.BlockSpec(aff_block, aff_index),
                pl.BlockSpec(aff_block, aff_index),
            ],
            out_specs=pl.BlockSpec((row_tile, col_tile), x_index),
        ),
        compiler_params=pltpu.CompilerParams(
            # Elementwise op: both grid axes are independent -> eligible for
            # TensorCore sharding (megacore / v7x dual-TC).
            dimension_semantics=("parallel", "parallel"),
            vmem_limit_bytes=vmem_limit,
        ),
        # Note: if the caller does not need x afterwards, input_output_aliases
        # {0: 0} would drop the extra HBM allocation; left off to keep x intact.
    )(x_flat, scale_arr, shift_arr)

    return out_flat.reshape(N, C, H, W)


if __name__ == "__main__":
    key = jax.random.PRNGKey(0)

    def check(case_key, N, C, H, W):
        kx, kw, kb, km, kv = jax.random.split(case_key, 5)
        x = jax.random.normal(kx, (N, C, H, W), dtype=jnp.float32)
        # Deterministic "frozen" buffers. Module __init__ defaults
        # (weight=1, bias=0, mean=0, var=1-eps) perturbed so the affine is
        # non-trivial.
        weight = jnp.ones((C,), jnp.float32) + 0.1 * jax.random.normal(kw, (C,))
        bias = 0.1 * jax.random.normal(kb, (C,))
        running_mean = 0.1 * jax.random.normal(km, (C,))
        running_var = (jnp.ones((C,), jnp.float32) - EPSILON
                       + 0.05 * jnp.abs(jax.random.normal(kv, (C,))))

        y = jax.block_until_ready(
            frozen_batch_norm_2d(x, weight, bias, running_mean, running_var))

        # Reference in plain JAX (same math as the PyTorch forward).
        scale = weight * lax.rsqrt(running_var + EPSILON)
        shift = bias - running_mean * scale
        y_ref = x * scale.reshape(1, C, 1, 1) + shift.reshape(1, C, 1, 1)

        assert y.shape == (N, C, H, W)
        assert y.dtype == x.dtype
        assert jnp.allclose(y, y_ref, atol=1e-5, rtol=1e-5)

    k0, k1 = jax.random.split(key)
    check(k0, 2, 4, 16, 16)   # H*W % 128 == 0 -> (N*C, H*W) per-row-affine layout
    check(k1, 2, 4, 7, 7)     # small H*W       -> lane-dense (N, C*H*W) layout

    print("KERNEL_OK")
</pallas_src>

<mosaic_0001>
module attributes {stable_mosaic.version = 11 : i64} {
  func.func @_frozen_bn_affine_kernel(%arg0: i32, %arg1: i32, %arg2: memref<8x256xf32, #tpu.memory_space<vmem>>, %arg3: memref<8x1xf32, #tpu.memory_space<vmem>>, %arg4: memref<8x1xf32, #tpu.memory_space<vmem>>, %arg5: memref<8x256xf32, #tpu.memory_space<vmem>>) attributes {dimension_semantics = [#tpu.dimension_semantics<parallel>, #tpu.dimension_semantics<parallel>], iteration_bounds = array<i64: 1, 1>, scalar_prefetch = 0 : i64, scratch_operands = 0 : i64, tpu.core_type = #tpu.core_type<tc>, window_params = [{transform_indices = @transform_0, window_bounds = array<i64: 8, 256>}, {transform_indices = @transform_1, window_bounds = array<i64: 8, 1>}, {transform_indices = @transform_2, window_bounds = array<i64: 8, 1>}, {transform_indices = @transform_3, window_bounds = array<i64: 8, 256>}]} {
    %c0 = arith.constant 0 : index
    %c0_0 = arith.constant 0 : index
    %0 = vector.load %arg2[%c0, %c0_0] : memref<8x256xf32, #tpu.memory_space<vmem>>, vector<8x256xf32>
    %c0_1 = arith.constant 0 : index
    %c0_2 = arith.constant 0 : index
    %1 = vector.load %arg3[%c0_1, %c0_2] : memref<8x1xf32, #tpu.memory_space<vmem>>, vector<8x1xf32>
    %2 = vector.broadcast %1 : vector<8x1xf32> to vector<8x256xf32>
    %3 = arith.mulf %0, %2 : vector<8x256xf32>
    %c0_3 = arith.constant 0 : index
    %c0_4 = arith.constant 0 : index
    %4 = vector.load %arg4[%c0_3, %c0_4] : memref<8x1xf32, #tpu.memory_space<vmem>>, vector<8x1xf32>
    %5 = vector.broadcast %4 : vector<8x1xf32> to vector<8x256xf32>
    %6 = arith.addf %3, %5 : vector<8x256xf32>
    %c0_5 = arith.constant 0 : index
    %c0_6 = arith.constant 0 : index
    %7 = vector.load %arg5[%c0_5, %c0_6] : memref<8x256xf32, #tpu.memory_space<vmem>>, vector<8x256xf32>
    tpu.vector_store %arg5[%c0_5, %c0_6], %6 {strides = array<i32>} : memref<8x256xf32, #tpu.memory_space<vmem>>, vector<8x256xf32>,
    return
  }
  func.func @transform_0(%arg0: i32, %arg1: i32) -> (i32, i32) {
    %c0_i32 = arith.constant 0 : i32
    return %arg0, %arg1 : i32, i32
  }
  func.func @transform_1(%arg0: i32, %arg1: i32) -> (i32, i32) {
    %c0_i32 = arith.constant 0 : i32
    %c0_i32_0 = arith.constant 0 : i32
    return %arg0, %c0_i32 : i32, i32
  }
  func.func @transform_2(%arg0: i32, %arg1: i32) -> (i32, i32) {
    %c0_i32 = arith.constant 0 : i32
    %c0_i32_0 = arith.constant 0 : i32
    return %arg0, %c0_i32 : i32, i32
  }
  func.func @transform_3(%arg0: i32, %arg1: i32) -> (i32, i32) {
    %c0_i32 = arith.constant 0 : i32
    return %arg0, %arg1 : i32, i32
  }
}

</mosaic_0001>

<bundles_post_ra>
// kernel: tile.18
= control target key start
LH: loop header
LB: loop body
LE: loop exit
PB: predicated region body
PF: predicated region fallthrough
CT: control target
= control target key end

     0   :  { %s22_s0 = inlined_call_operand.vmem [shape: f32[4], index: 0, kind: input, shape index: {}]   ;;  %s23_s1 = inlined_call_operand.vmem [shape: f32[2,4], index: 1, kind: output, shape index: {}]  }
   0x1   :  { %v4_v0 = vld [vmem:[%s22_s0] ss:$0 sm:$0xff] }
   0x2   :  { %5 = vst [vmem:[%s23_s1] sm:$0x3] %v4_v0 }

// kernel: tile.0
= control target key start
LH: loop header
LB: loop body
LE: loop exit
PB: predicated region body
PF: predicated region fallthrough
CT: control target
= control target key end

     0   :  { %s34_s8 = smov 125   ;;  %vm7_vm0 = vcmask 7168   ;;  %s35_s11 = smov 126   ;;  %s61_s0 = inlined_call_operand.vmem [shape: f32[2,4], index: 0, kind: input, shape index: {}]   ;;  %s62_s1 = inlined_call_operand.vmem [shape: f32[8,1], index: 1, kind: output, shape index: {}]  }
   0x1   :  { %v4_v0 = vld [vmem:[%s61_s0] sm:$0x3]  ;;  %s33_s0 = smov 127  }
   0x2   :  { %5 = vst [vmem:[#allocation0] sm:$0x3] %v4_v0 }
   0x9   :  { %v9_v1 = vld [vmem:[#allocation0] sm:$0x3]  }
   0xa   :  { %v21_v2 = vld [vmem:[#allocation0] sm:$0x3]   ;;  %10 = vrot.lane.b32.xlu0 %v9_v1, %s33_s0 }
   0xb   :  { %22 = vrot.lane.b32.xlu1 %v21_v2, %s34_s8  ;;  %v6_v3 = vld [vmem:[#allocation0] sm:$0x3]  }
   0xc   :  { %v15_v4 = vld [vmem:[#allocation0] sm:$0x3]   ;;  %8 = vst.msk [vmem:[%s62_s1] ss:$4 sm:$0x3] %vm7_vm0, %v6_v3  }
   0xe   :  { %16 = vrot.lane.b32.xlu0 %v15_v4, %s35_s11 }
  0x7c   :  { %v11_v5 = vpop.permute.xlu0 %10  }
  0x7d   :  { %v23_v6 = vpop.permute.xlu1 %22   ;;  %27 = vst.msk [vmem:[%s62_s1 + $0x1] ss:$4 sm:$0x3] %vm7_vm0, %v11_v5  }
  0x7e   :  { %29 = vst.msk [vmem:[%s62_s1 + $0x3] ss:$4 sm:$0x3] %vm7_vm0, %v23_v6  }
  0x80   :  { %v17_v7 = vpop.permute.xlu0 %16  }
  0x81   :  { %28 = vst.msk [vmem:[%s62_s1 + $0x2] ss:$4 sm:$0x3] %vm7_vm0, %v17_v7  }

// kernel: frozen_batch_norm_2d.1
= control target key start
LH: loop header
LB: loop body
LE: loop exit
PB: predicated region body
PF: predicated region fallthrough
CT: control target
= control target key end

     0   :  { %v40_v0 = vmov 0   ;;  %s79_s1 = inlined_call_operand.vmem [shape: f32[8,1], index: 1, kind: input, shape index: {}]   ;;  %s80_s2 = inlined_call_operand.vmem [shape: f32[8,1], index: 2, kind: input, shape index: {}]   ;;  %s81_s0 = inlined_call_operand.vmem [shape: f32[8,256], index: 0, kind: input, shape index: {}]   ;;  %s82_s3 = inlined_call_operand.vmem [shape: f32[8,256], index: 3, kind: output, shape index: {}]  }
   0x1   :  { %39 = vset.pattern.permute.xlu0 %v40_v0  ;;  %v16_v1 = vld [vmem:[%s79_s1] sm:$0xff]  ;;  %v15_v5 = vld [vmem:[%s81_s0 + $0x8] sm:$0xff] }
   0x2   :  { %19 = vperm.xlu0 %39, %v16_v1   ;;  %v24_v2 = vld [vmem:[%s80_s2] sm:$0xff] }
   0x3   :  { %v14_v4 = vld [vmem:[%s81_s0] sm:$0xff] }
   0x6   :  { %27 = vperm.xlu0 %39, %v24_v2  }
  0x81   :  { %v20_v3 = vpop.permute.xlu0 %19 }
  0x82   :  { %v22_v6 = vmul.f32 %v20_v3, %v14_v4  ;;  %v23_v7 = vmul.f32 %v20_v3, %v15_v5 }
  0x85   :  { %v28_v8 = vpop.permute.xlu0 %27 }
  0x86   :  { %v30_v9 = vadd.f32 %v28_v8, %v22_v6  ;;  %v31_v10 = vadd.f32 %v28_v8, %v23_v7 }
  0x88   :  { %32 = vst [vmem:[%s82_s3] sm:$0xff] %v30_v9  ;;  %33 = vst [vmem:[%s82_s3 + $0x8] sm:$0xff] %v31_v10 }

</bundles_post_ra>
